<compile_context>
chip_gen: v6e
topology: v6e:2x2x1
jax: 0.10.0
libtpu: 0.0.40
codegen_flags: <defaults>
</compile_context>

<pallas_src>
import functools

import jax
import jax.numpy as jnp
from jax.experimental import pallas as pl
from jax.experimental.pallas import tpu as pltpu


# ----------------------------------------------------------------------------
# Kernels
# ----------------------------------------------------------------------------

def _ffn_kernel_resident(x_ref, w12_ref, b12_ref, w2_ref, b2_ref, o_ref):
    """Whole-d_ff kernel: weights are VMEM-resident, grid = (row tiles,)."""
    x = x_ref[...].astype(jnp.bfloat16)                               # (tm, D)

    h = jnp.dot(x, w12_ref[0], preferred_element_type=jnp.float32) + b12_ref[0]
    v = jnp.dot(x, w12_ref[1], preferred_element_type=jnp.float32) + b12_ref[1]
    u = (jnp.maximum(h, 0.0) * v).astype(w2_ref.dtype)                # gate in f32, downcast for MXU
    # dropout: identity in eval mode.
    o_ref[...] = (jnp.dot(u, w2_ref[...], preferred_element_type=jnp.float32)
                  + b2_ref[...]).astype(o_ref.dtype)


def _ffn_kernel_stream(x_ref, w12_ref, b12_ref, w2_ref, b2_ref, o_ref, *maybe_acc):
    """Tiled d_ff reduction kernel, grid = (row tiles, d_ff chunks)."""
    # f32 outputs accumulate directly into the resident output block; other
    # output dtypes use a dedicated f32 VMEM scratch.
    acc_ref = maybe_acc[0] if maybe_acc else o_ref
    k = pl.program_id(1)

    @pl.when(k == 0)
    def _():
        acc_ref[...] = jnp.zeros_like(acc_ref)

    x = x_ref[...].astype(jnp.bfloat16)                               # (tm, D)

    h = jnp.dot(x, w12_ref[0], preferred_element_type=jnp.float32) + b12_ref[0]
    v = jnp.dot(x, w12_ref[1], preferred_element_type=jnp.float32) + b12_ref[1]
    u = (jnp.maximum(h, 0.0) * v).astype(w2_ref.dtype)
    # dropout: identity in eval mode.
    acc_ref[...] += jnp.dot(u, w2_ref[...], preferred_element_type=jnp.float32)

    @pl.when(k == pl.num_programs(1) - 1)
    def _():
        o_ref[...] = (acc_ref[...] + b2_ref[...]).astype(o_ref.dtype)


# ----------------------------------------------------------------------------
# Planning helpers
# ----------------------------------------------------------------------------

def _round_up(n, m):
    return ((n + m - 1) // m) * m


def _cdiv(a, b):
    return -(-a // b)


def _device_vmem_bytes():
    try:
        return int(pltpu.get_tpu_info().vmem_capacity_bytes)
    except Exception:
        return 64 << 20   # conservative default (covers v7x's 64 MiB per TC)


def _resident_fp(tm, D, F, out_isize):
    w = 2 * (2 * D * F * 2 + F * D * 2)          # fused W1/Wv + W2 (bf16), x2 buffers
    b = 2 * (2 * F * 4 + D * 4)                  # biases (f32), x2 buffers
    x = 2 * tm * D * 4                           # x tile (orig dtype, worst-case f32)
    o = 2 * tm * D * out_isize                   # output tile
    inter = 14 * tm * F                          # h/v f32 + u bf16 temporaries
    return w + b + x + o + inter


def _stream_fp(tm, D, tf, out_isize, use_scratch):
    w = 2 * (2 * D * tf * 2 + tf * D * 2)        # streamed weight slices, x2 buffers
    b = 2 * (2 * tf * 4 + D * 4)
    x = 2 * tm * D * 4
    o = 2 * tm * D * out_isize
    acc = tm * D * 4 if use_scratch else 0
    inter = 14 * tm * tf
    return w + b + x + o + acc + inter


def _plan(M, D, F, out_isize, use_scratch, budget, *, tm=None, tf=None,
          force_stream=False):
    tm_user = tm is not None
    if tm is None:
        tm = min(512, _round_up(M, 8))
        # keep at least 2 row tiles so megacore (v7x) can shard the row axis
        if _cdiv(M, tm) < 2 and M >= 16:
            tm = _round_up(_cdiv(M, 2), 8)
    else:
        tm = max(8, _round_up(tm, 8))

    if tm_user:
        tm_cands = [tm]
    else:
        tm_cands = sorted({t for t in (tm, 256, 128, 64, 32, 16, 8) if t <= tm},
                          reverse=True)

    if tf is not None:
        tf = max(128, _round_up(tf, 128))
        f_pad = _round_up(F, tf)
        tf_cands = [tf]
    else:
        f_pad = _round_up(F, 128)
        tf_cands = [t for t in (512, 256, 128) if f_pad % t == 0] or [f_pad]

    # Weight-resident fast path (weights DMA'd once, no reduction grid axis).
    if not force_stream:
        min_resident_tm = min(128, tm_cands[0])
        for t in tm_cands:
            if t < min_resident_tm:
                continue
            fp = _resident_fp(t, D, F, out_isize)
            if fp <= budget:
                return {"resident": True, "tm": t, "fp": fp}

    # Streaming path: largest (tm, tf) that fits.
    for t in tm_cands:
        for tfc in tf_cands:
            fp = _stream_fp(t, D, tfc, out_isize, use_scratch)
            if fp <= budget:
                return {"resident": False, "tm": t, "tf": tfc, "F_pad": f_pad,
                        "fp": fp}

    # Last resort: smallest streaming config (may exceed the heuristic budget).
    t, tfc = tm_cands[-1], tf_cands[-1]
    return {"resident": False, "tm": t, "tf": tfc, "F_pad": f_pad,
            "fp": _stream_fp(t, D, tfc, out_isize, use_scratch)}


# ----------------------------------------------------------------------------
# Wrapper
# ----------------------------------------------------------------------------

def feed_forward_pallas(x, params, *, tm=None, tf=None, force_stream=False):
    """x: (batch, seq, d_model). params: fused transposed bf16 weights + f32 biases."""
    B, S, D = x.shape
    M = B * S
    out_dtype = x.dtype
    out_isize = jnp.dtype(out_dtype).itemsize
    use_scratch = jnp.dtype(out_dtype) != jnp.dtype(jnp.float32)

    w12, b12 = params["w12t"], params["b12"]     # (2, D, F) bf16, (2, 1, F) f32
    w2t, b2 = params["w2t"], params["b2"]        # (F, D) bf16, (1, D) f32
    F = w12.shape[-1]

    vmem_cap = _device_vmem_bytes()
    budget = int(vmem_cap * 0.85)

    plan = _plan(M, D, F, out_isize, use_scratch, budget,
                 tm=tm, tf=tf, force_stream=force_stream)
    tm = plan["tm"]

    vmem_limit = int(min(vmem_cap - (2 << 20),
                         max(32 << 20, plan["fp"] + (8 << 20))))
    vmem_limit = max(vmem_limit, min(plan["fp"] + (2 << 20), vmem_cap - (2 << 20)))

    x2d = x.reshape(M, D)   # no cast / no row pad: boundary blocks are masked

    if plan["resident"]:
        grid = (pl.cdiv(M, tm),)
        out2d = pl.pallas_call(
            _ffn_kernel_resident,
            out_shape=jax.ShapeDtypeStruct((M, D), out_dtype),
            grid_spec=pltpu.PrefetchScalarGridSpec(
                num_scalar_prefetch=0,
                grid=grid,
                in_specs=[
                    pl.BlockSpec((tm, D), lambda i: (i, 0)),        # x rows
                    pl.BlockSpec((2, D, F), lambda i: (0, 0, 0)),   # W1^T|Wv^T (resident)
                    pl.BlockSpec((2, 1, F), lambda i: (0, 0, 0)),   # b1|bv
                    pl.BlockSpec((F, D), lambda i: (0, 0)),         # W2^T (resident)
                    pl.BlockSpec((1, D), lambda i: (0, 0)),         # b2
                ],
                out_specs=pl.BlockSpec((tm, D), lambda i: (i, 0)),
            ),
            compiler_params=pltpu.CompilerParams(
                dimension_semantics=("parallel",),
                vmem_limit_bytes=vmem_limit,
            ),
        )(x2d, w12, b12, w2t, b2)
        return out2d.reshape(B, S, D)

    # Streaming path: tiled d_ff reduction.
    tf = plan["tf"]
    F_pad = plan["F_pad"]
    if F_pad != F:
        # zero-pad the hidden dim once so every slice stays (8,128)-aligned;
        # padded columns contribute exactly zero to the output.
        w12 = jnp.pad(w12, ((0, 0), (0, 0), (0, F_pad - F)))
        b12 = jnp.pad(b12, ((0, 0), (0, 0), (0, F_pad - F)))
        w2t = jnp.pad(w2t, ((0, F_pad - F), (0, 0)))

    grid = (pl.cdiv(M, tm), F_pad // tf)
    scratch = [pltpu.VMEM((tm, D), jnp.float32)] if use_scratch else []

    out2d = pl.pallas_call(
        _ffn_kernel_stream,
        out_shape=jax.ShapeDtypeStruct((M, D), out_dtype),
        grid_spec=pltpu.PrefetchScalarGridSpec(
            num_scalar_prefetch=0,
            grid=grid,
            in_specs=[
                pl.BlockSpec((tm, D), lambda i, k: (i, 0)),       # x rows (fetched once per i)
                pl.BlockSpec((2, D, tf), lambda i, k: (0, 0, k)), # W1^T|Wv^T slice
                pl.BlockSpec((2, 1, tf), lambda i, k: (0, 0, k)), # b1|bv slice
                pl.BlockSpec((tf, D), lambda i, k: (k, 0)),       # W2^T slice
                pl.BlockSpec((1, D), lambda i, k: (0, 0)),        # b2
            ],
            out_specs=pl.BlockSpec((tm, D), lambda i, k: (i, 0)),
            scratch_shapes=scratch,
        ),
        compiler_params=pltpu.CompilerParams(
            dimension_semantics=("parallel", "arbitrary"),
            vmem_limit_bytes=vmem_limit,
        ),
    )(x2d, w12, b12, w2t, b2)

    return out2d.reshape(B, S, D)


# ----------------------------------------------------------------------------
# Params / reference
# ----------------------------------------------------------------------------

def init_params(key, d_model, d_ff):
    """Mirrors nn.Linear init; W1/Wv fused and stored transposed in bf16, biases f32."""
    k1, k2, k3, k4, k5, k6 = jax.random.split(key, 6)
    s1 = 1.0 / jnp.sqrt(d_model)
    s2 = 1.0 / jnp.sqrt(d_ff)
    w1 = jax.random.uniform(k1, (d_ff, d_model), jnp.float32, -s1, s1)
    b1 = jax.random.uniform(k2, (d_ff,), jnp.float32, -s1, s1)
    wv = jax.random.uniform(k3, (d_ff, d_model), jnp.float32, -s1, s1)
    bv = jax.random.uniform(k4, (d_ff,), jnp.float32, -s1, s1)
    w2 = jax.random.uniform(k5, (d_model, d_ff), jnp.float32, -s2, s2)
    b2 = jax.random.uniform(k6, (d_model,), jnp.float32, -s2, s2)
    w12t = jnp.stack([w1.T, wv.T], axis=0).astype(jnp.bfloat16)       # (2, D, F)
    b12 = jnp.stack([b1.reshape(1, -1), bv.reshape(1, -1)], axis=0)   # (2, 1, F)
    return {"w12t": w12t, "b12": b12,
            "w2t": w2.T.astype(jnp.bfloat16), "b2": b2.reshape(1, -1)}


def feed_forward_ref(x, params):
    """Pure-JAX reference with the same mixed-precision recipe as the kernel."""
    B, S, D = x.shape
    xb = x.reshape(-1, D).astype(jnp.bfloat16)
    h = jnp.dot(xb, params["w12t"][0], preferred_element_type=jnp.float32) + params["b12"][0]
    v = jnp.dot(xb, params["w12t"][1], preferred_element_type=jnp.float32) + params["b12"][1]
    u = (jnp.maximum(h, 0.0) * v).astype(jnp.bfloat16)
    out = jnp.dot(u, params["w2t"], preferred_element_type=jnp.float32) + params["b2"]
    return out.reshape(B, S, D).astype(x.dtype)


# ----------------------------------------------------------------------------
# Demo / self-check
# ----------------------------------------------------------------------------

if __name__ == "__main__":
    key = jax.random.PRNGKey(0)
    kx, kp, kx2, kp2 = jax.random.split(key, 4)

    # Small demo consistent with the module: (batch, seq, d_model).
    d_model, d_ff = 32, 64
    batch, seq = 2, 8
    x = jax.random.normal(kx, (batch, seq, d_model), jnp.float32)
    params = init_params(kp, d_model, d_ff)

    out = jax.block_until_ready(jax.jit(feed_forward_pallas)(x, params))
    ref = feed_forward_ref(x, params)
    assert out.shape == (batch, seq, d_model)
    assert jnp.allclose(out, ref, atol=2e-2, rtol=2e-2), "mismatch vs reference"

    # Second check: force the streaming (d_ff reduction) path, 2 k chunks, and
    # ragged rows (21 rows -> boundary row block) — no explicit padding needed.
    d_model2, d_ff2 = 128, 256
    batch2, seq2 = 3, 7
    x2 = jax.random.normal(kx2, (batch2, seq2, d_model2), jnp.float32)
    params2 = init_params(kp2, d_model2, d_ff2)
    out2 = jax.block_until_ready(
        jax.jit(functools.partial(feed_forward_pallas, tf=128, force_stream=True))(
            x2, params2))
    ref2 = feed_forward_ref(x2, params2)
    assert out2.shape == (batch2, seq2, d_model2)
    assert jnp.allclose(out2, ref2, atol=2e-2, rtol=2e-2), "mismatch vs reference (tiled)"

    print("KERNEL_OK")
</pallas_src>

<mosaic_0001>
module attributes {stable_mosaic.version = 11 : i64} {
  func.func @_ffn_kernel_resident(%arg0: i32, %arg1: memref<8x32xf32, #tpu.memory_space<vmem>>, %arg2: memref<2x32x64xbf16, #tpu.memory_space<vmem>>, %arg3: memref<2x1x64xf32, #tpu.memory_space<vmem>>, %arg4: memref<64x32xbf16, #tpu.memory_space<vmem>>, %arg5: memref<1x32xf32, #tpu.memory_space<vmem>>, %arg6: memref<8x32xf32, #tpu.memory_space<vmem>>) attributes {dimension_semantics = [#tpu.dimension_semantics<parallel>], iteration_bounds = array<i64: 2>, scalar_prefetch = 0 : i64, scratch_operands = 0 : i64, tpu.core_type = #tpu.core_type<tc>, window_params = [{transform_indices = @transform_0, window_bounds = array<i64: 8, 32>}, {pipeline_mode = #tpu.pipeline_mode<synchronous>, transform_indices = @transform_1, window_bounds = array<i64: 2, 32, 64>}, {pipeline_mode = #tpu.pipeline_mode<synchronous>, transform_indices = @transform_2, window_bounds = array<i64: 2, 1, 64>}, {pipeline_mode = #tpu.pipeline_mode<synchronous>, transform_indices = @transform_3, window_bounds = array<i64: 64, 32>}, {pipeline_mode = #tpu.pipeline_mode<synchronous>, transform_indices = @transform_4, window_bounds = array<i64: 1, 32>}, {transform_indices = @transform_5, window_bounds = array<i64: 8, 32>}]} {
    %c0 = arith.constant 0 : index
    %c0_0 = arith.constant 0 : index
    %0 = vector.load %arg1[%c0, %c0_0] : memref<8x32xf32, #tpu.memory_space<vmem>>, vector<8x32xf32>
    %1 = arith.truncf %0 : vector<8x32xf32> to vector<8x32xbf16>
    %c0_1 = arith.constant 0 : index
    %c0_2 = arith.constant 0 : index
    %c0_3 = arith.constant 0 : index
    %2 = vector.load %arg2[%c0_1, %c0_2, %c0_3] : memref<2x32x64xbf16, #tpu.memory_space<vmem>>, vector<1x32x64xbf16>
    %3 = vector.shape_cast %2 : vector<1x32x64xbf16> to vector<32x64xbf16>
    %cst = arith.constant dense<0.000000e+00> : vector<8x64xf32>
    %4 = tpu.matmul %1, %3, %cst {dimension_numbers = #tpu.dot_dimension_numbers<[1], [0], [0], [1], [0, 0, 1, 1], [], []>} : vector<8x32xbf16>, vector<32x64xbf16>, vector<8x64xf32> -> vector<8x64xf32>
    %c0_4 = arith.constant 0 : index
    %c0_5 = arith.constant 0 : index
    %c0_6 = arith.constant 0 : index
    %5 = vector.load %arg3[%c0_4, %c0_5, %c0_6] : memref<2x1x64xf32, #tpu.memory_space<vmem>>, vector<1x1x64xf32>
    %6 = vector.shape_cast %5 : vector<1x1x64xf32> to vector<1x64xf32>
    %7 = vector.broadcast %6 : vector<1x64xf32> to vector<8x64xf32>
    %8 = arith.addf %4, %7 : vector<8x64xf32>
    %c1 = arith.constant 1 : index
    %c0_7 = arith.constant 0 : index
    %c0_8 = arith.constant 0 : index
    %9 = vector.load %arg2[%c1, %c0_7, %c0_8] : memref<2x32x64xbf16, #tpu.memory_space<vmem>>, vector<1x32x64xbf16>
    %10 = vector.shape_cast %9 : vector<1x32x64xbf16> to vector<32x64xbf16>
    %cst_9 = arith.constant dense<0.000000e+00> : vector<8x64xf32>
    %11 = tpu.matmul %1, %10, %cst_9 {dimension_numbers = #tpu.dot_dimension_numbers<[1], [0], [0], [1], [0, 0, 1, 1], [], []>} : vector<8x32xbf16>, vector<32x64xbf16>, vector<8x64xf32> -> vector<8x64xf32>
    %c1_10 = arith.constant 1 : index
    %c0_11 = arith.constant 0 : index
    %c0_12 = arith.constant 0 : index
    %12 = vector.load %arg3[%c1_10, %c0_11, %c0_12] : memref<2x1x64xf32, #tpu.memory_space<vmem>>, vector<1x1x64xf32>
    %13 = vector.shape_cast %12 : vector<1x1x64xf32> to vector<1x64xf32>
    %14 = vector.broadcast %13 : vector<1x64xf32> to vector<8x64xf32>
    %15 = arith.addf %11, %14 : vector<8x64xf32>
    %cst_13 = arith.constant 0.000000e+00 : f32
    %16 = vector.broadcast %cst_13 : f32 to vector<8x64xf32>
    %17 = arith.maximumf %8, %16 : vector<8x64xf32>
    %18 = arith.mulf %17, %15 : vector<8x64xf32>
    %19 = arith.truncf %18 : vector<8x64xf32> to vector<8x64xbf16>
    %c0_14 = arith.constant 0 : index
    %c0_15 = arith.constant 0 : index
    %20 = vector.load %arg4[%c0_14, %c0_15] : memref<64x32xbf16, #tpu.memory_space<vmem>>, vector<64x32xbf16>
    %cst_16 = arith.constant dense<0.000000e+00> : vector<8x32xf32>
    %21 = tpu.matmul %19, %20, %cst_16 {dimension_numbers = #tpu.dot_dimension_numbers<[1], [0], [0], [1], [0, 0, 1, 1], [], []>} : vector<8x64xbf16>, vector<64x32xbf16>, vector<8x32xf32> -> vector<8x32xf32>
    %c0_17 = arith.constant 0 : index
    %c0_18 = arith.constant 0 : index
    %22 = vector.load %arg5[%c0_17, %c0_18] : memref<1x32xf32, #tpu.memory_space<vmem>>, vector<1x32xf32>
    %23 = vector.broadcast %22 : vector<1x32xf32> to vector<8x32xf32>
    %24 = arith.addf %21, %23 : vector<8x32xf32>
    %c0_19 = arith.constant 0 : index
    %c0_20 = arith.constant 0 : index
    %25 = vector.load %arg6[%c0_19, %c0_20] : memref<8x32xf32, #tpu.memory_space<vmem>>, vector<8x32xf32>
    tpu.vector_store %arg6[%c0_19, %c0_20], %24 {strides = array<i32>} : memref<8x32xf32, #tpu.memory_space<vmem>>, vector<8x32xf32>,
    return
  }
  func.func @transform_0(%arg0: i32) -> (i32, i32) {
    %c0_i32 = arith.constant 0 : i32
    %c0_i32_0 = arith.constant 0 : i32
    return %arg0, %c0_i32 : i32, i32
  }
  func.func @transform_1(%arg0: i32) -> (i32, i32, i32) {
    %c0_i32 = arith.constant 0 : i32
    %c0_i32_0 = arith.constant 0 : i32
    %c0_i32_1 = arith.constant 0 : i32
    %c0_i32_2 = arith.constant 0 : i32
    return %c0_i32, %c0_i32_0, %c0_i32_1 : i32, i32, i32
  }
  func.func @transform_2(%arg0: i32) -> (i32, i32, i32) {
    %c0_i32 = arith.constant 0 : i32
    %c0_i32_0 = arith.constant 0 : i32
    %c0_i32_1 = arith.constant 0 : i32
    %c0_i32_2 = arith.constant 0 : i32
    return %c0_i32, %c0_i32_0, %c0_i32_1 : i32, i32, i32
  }
  func.func @transform_3(%arg0: i32) -> (i32, i32) {
    %c0_i32 = arith.constant 0 : i32
    %c0_i32_0 = arith.constant 0 : i32
    %c0_i32_1 = arith.constant 0 : i32
    return %c0_i32, %c0_i32_0 : i32, i32
  }
  func.func @transform_4(%arg0: i32) -> (i32, i32) {
    %c0_i32 = arith.constant 0 : i32
    %c0_i32_0 = arith.constant 0 : i32
    %c0_i32_1 = arith.constant 0 : i32
    return %c0_i32, %c0_i32_0 : i32, i32
  }
  func.func @transform_5(%arg0: i32) -> (i32, i32) {
    %c0_i32 = arith.constant 0 : i32
    %c0_i32_0 = arith.constant 0 : i32
    return %arg0, %c0_i32 : i32, i32
  }
}

</mosaic_0001>

<bundles_post_ra>
// kernel: feed_forward_pallas.1
= control target key start
LH: loop header
LB: loop body
LE: loop exit
PB: predicated region body
PF: predicated region fallthrough
CT: control target
= control target key end

     0   :  { %10 = vsyncpa [#allocation3], 0  ;;  %s865_s0 = inlined_call_operand.vmem [shape: f32[16,32], index: 0, kind: input, shape index: {}]   ;;  %s866_s1 = inlined_call_operand.vmem [shape: bf16[2,32,64], index: 1, kind: input, shape index: {}]   ;;  %s867_s2 = inlined_call_operand.vmem [shape: f32[2,1,64], index: 2, kind: input, shape index: {}]   ;;  %s868_s3 = inlined_call_operand.vmem [shape: bf16[64,32], index: 3, kind: input, shape index: {}]   ;;  %s869_s4 = inlined_call_operand.vmem [shape: f32[1,32], index: 4, kind: input, shape index: {}]   ;;  %s870_s5 = inlined_call_operand.hbm [shape: f32[16,32], index: 5, kind: output, shape index: {}]  }
   0x1   :  { %12 = vsyncpa [#allocation3 + $0x1], 0  ;;  %s727_s18 = smov 0   ;;  %s729_s19 = smov 0  }
   0x2   :  { %s731_s20 = smov 0   ;;  %s733_s21 = smov 0  }
   0x3 LB: > { %s748_s22 = sadd.s32 4294967295, %s692_s21   ;;  %s515_s23 = sadd.s32 4294967294, %s692_s21   ;;  %s692_s21 = sphi %s733_s21, %s876_s21   ;;  %s688_s20 = sphi %s731_s20, %s875_s20   ;;  %s684_s19 = sphi %s729_s19, %s874_s19   ;;  %s680_s18 = sphi %s727_s18, %s873_s18  }
   0x4   : > { %s752_s24 = sadd.s32 1, %s692_s21   ;;  %s135_s25 = sadd.s32 1, %s688_s20 }
   0x5   : > { %s132_s26 = ssub.s32 %s692_s21, %s752_s24  ;;  %p145_p0 = scmp.ne.s32.totalorder %s688_s20, %s684_s19 }
   0x6   : > { %p133_p1 = scmp.eq.s32.totalorder %s132_s26, 0  ;;  %p146_p2 = scmp.eq.s32.totalorder %s748_s22, 1 }
   0x7   : > { %p151_p3 = scmp.ne.s32.totalorder %s684_s19, %s680_s18  ;;  %p152_p4 = scmp.eq.s32.totalorder %s515_s23, 1 }
   0x8   : > { %s763_s27 = scalar_select %p133_p1, %s688_s20, %s135_s25  }
   0x9   : > { %p765_p5 = por %p146_p2, %p145_p0  ;;  %p769_p6 = por %p152_p4, %p151_p3 }
   0xa   : > { %p518_p7 = scmp.ge.s32.totalorder %s692_s21, 1  ;;  %p189_p8 = scmp.lt.s32.totalorder %s692_s21, 3 }
   0xc   : > { %p190_p9 = pnand %p518_p7, %p189_p8 }
   0xd   : > { %p216_p10 = scmp.lt.s32.totalorder (!%p190_p9), %s748_s22, 1  ;;  %s213_s14 = sand.u32 (!%p190_p9), 1, %s684_s19  }
   0xe   : > { %193 = sbr.rel (%p190_p9) target bundleno = 444 (0x1bc), region = 40  ;;  %s519_s15 = sshll.u32 (!%p190_p9), %s213_s14, 3 }
   0xf   : > { %s541_s23 = sshll.u32 (!%p190_p9), %s748_s22, 7  ;;  %s215_s25 = scalar_lea.vmem (!%p190_p9), [#allocation2], %s519_s15 }
  0x10   : > { %s456_s26 = sshll.u32 (!%p190_p9), %s215_s25, 4  ;;  %s823_s7 = scalar_lea.hbm (!%p190_p9), %s870_s5, %s541_s23  ;;  %s825_s26 = int_to_ptr.vmem [resolvable:$true] %s456_s26 }
  0x11   : > { %s443_s8 = scalar_lea.sflag (!%p190_p9), [#allocation3], %s213_s14 }
  0x13   : > { %v624_v0 = vld [vmem:[%s866_s1 + $0x8] sm:$0xff]   ;;  %v694_v1 = vmov 0.0   ;;  %v625_v2 = vld [vmem:[%s866_s1] sm:$0xff]   ;;  %vm695_vm0 = vmmov 0   ;;  %s217_s9 = scalar_select %p216_p10, %s748_s22, 1  ;;  %vm246_vm1 = vcmask 261120  }
  0x14   : > { %555 = vmatprep.subr.bf16.mxu1 %v694_v1  ;;  %571 = vmatprep.subr.bf16.mxu0 %v694_v1  ;;  %v626_v4 = vld [vmem:[%s866_s1 + $0x18] sm:$0xff]   ;;  %v627_v6 = vld [vmem:[%s866_s1 + $0x10] sm:$0xff]   ;;  %v630_v9 = vld [vmem:[%s868_s3 + $0x8] sm:$0xff]   ;;  %vm397_vm2 = vcmask 523264   ;;  %s632_s22 = scalar_lea.vmem %s825_s26, 128 }
  0x15   : > { %556 = vmatpush3.bf16.msra.mxu1 %v624_v0  ;;  %559 = vmatprep.mubr.msk.bf16.mxu1 %vm695_vm0, %v694_v1  ;;  %s520_s10 = sshll.u32 %s217_s9, 3  ;;  %v628_v7 = vld [vmem:[%s868_s3 + $0x18] sm:$0xff]   ;;  %v629_v8 = vld [vmem:[%s868_s3 + $0x10] sm:$0xff]   ;;  %v631_v10 = vld [vmem:[%s868_s3] sm:$0xff]   ;;  %p633_p11 = scmp.ne.s32.totalorder %s825_s26, %s632_s22 }
  0x16   : > { %557 = vmatprep.subr.bf16.mxu1 %v694_v1  ;;  %579 = vmatprep.mubr.msk.bf16.mxu0 %vm695_vm0, %v694_v1  ;;  %s219_s13 = scalar_lea.vmem %s865_s0, %s520_s10  ;;  %v521_v12 = vld [vmem:[%s867_s2] ss:$0 sm:$0xff]  ;;  %v530_v17 = vld [vmem:[%s867_s2 + $0x1] ss:$0 sm:$0xff]  ;;  %s696_s9 = smov [#allocation2]  }
  0x17   : > { %v221_v3 = vld [vmem:[%s219_s13] sm:$0xff]  ;;  %572 = vmatpush3.bf16.msra.mxu0 %v628_v7  ;;  %p634_p12 = pnand %p633_p11, %p765_p5  ;;  %s636_s10 = sshll.u32 %s696_s9, 4  ;;  %s637_s10 = int_to_ptr.vmem [resolvable:$false] %s636_s10 }
  0x18   : > { %v222_v5 = vpack.c.bf16 %v221_v3, %v221_v3  ;;  %573 = vmatprep.subr.bf16.mxu0 %v694_v1  ;;  %v534_v26 = vld [vmem:[%s869_s4] ss:$0 sm:$0xff]  ;;  %s638_s11 = scalar_lea.vmem %s637_s10, 256  ;;  %p639_p0 = scmp.lt.s32.totalorder %s825_s26, %s637_s10 }
  0x19   : > { %558 = vmatpush3.bf16.msra.mxu1 %v625_v2  ;;  %p635_p13 = pneg %p634_p12  ;;  %p640_p1 = scmp.lt.s32.totalorder %s638_s11, %s632_s22 }
  0x1a   : > { %563 = vmatprep.subr.bf16.mxu1 %v694_v1 }
  0x1b   : > { %574 = vmatpush3.bf16.msra.mxu0 %v629_v8  ;;  %p641_p2 = por %p640_p1, %p639_p0 }
  0x1c   : > { %560 = vmatmul.mubr.msk.bf16.vlgmr.msra.gmra.mxu1 %vm246_vm1, %v222_v5  ;;  %575 = vmatprep.subr.bf16.mxu0 %v694_v1 }
  0x1d   : > { %564 = vmatpush3.bf16.msra.mxu1 %v626_v4  ;;  %567 = vmatprep.mubr.msk.bf16.mxu1 %vm695_vm0, %v694_v1  ;;  %p642_p3 = pnand %p641_p2, %p635_p13 }
  0x1e   : > { %565 = vmatprep.subr.bf16.mxu1 %v694_v1 }
  0x1f   : > { %576 = vmatpush3.bf16.msra.mxu0 %v630_v9 }
  0x20   : > { %577 = vmatprep.subr.bf16.mxu0 %v694_v1 }
  0x21   : > { %566 = vmatpush3.bf16.msra.mxu1 %v627_v6 }
  0x23   : > { %578 = vmatpush3.bf16.msra.mxu0 %v631_v10 }
  0x24   : > { %568 = vmatmul.mubr.msk.bf16.vlgmr.msra.gmra.mxu1 %vm246_vm1, %v222_v5 }
  0xdc   : > { %v284_v11 = vpop.f32.mrf.mxu1 }
  0xdd   : > { %v285_v15 = vadd.f32 %v521_v12, %v284_v11 }
  0xde   : > { %v561_v13 = vpop.f32.mrf.mxu1 }
  0xdf   : > { %v355_v19 = vmax.f32 %v285_v15, 0.0 }
  0xe0   : > { %v287_v14 = vpop.f32.mrf.mxu1 }
  0xe2   : > { %v562_v16 = vpop.f32.mrf.mxu1 }
  0xe4   : > { %v349_v18 = vpop.f32.mrf.mxu1 }
  0xe5   : > { %v350_v20 = vadd.f32 %v530_v17, %v349_v18 }
  0xe6   : > { %v569_v21 = vpop.f32.mrf.mxu1 }
  0xe7   : > { %v356_v22 = vmul.f32 %v355_v19, %v350_v20 }
  0xe8   : > { %v352_v23 = vpop.f32.mrf.mxu1 }
  0xe9   : > { %v357_v24 = vpack.c.bf16 %v356_v22, %v356_v22 }
  0xea   : > { %v570_v25 = vpop.f32.mrf.mxu1 }
  0xeb   : > { %580 = vmatmul.mubr.msk.bf16.vlgmr.msra.gmra.mxu0 %vm397_vm2, %v357_v24 }
 0x1ab   : > { %v435_v27 = vpop.f32.mrf.mxu0 }
 0x1ac   : > { %v436_v28 = vadd.f32 %v534_v26, %v435_v27 }
 0x1ad   : > { %v581_v29 = vpop.f32.mrf.mxu0 }
 0x1ae   : > { %441 = vst.msk [vmem:[%s215_s25] sm:$0xff] %vm246_vm1, %v436_v28 }
 0x1af   : > { %v438_v30 = vpop.f32.mrf.mxu0 }
 0x1b0   : > { %645 = shalt.err (!%p642_p3)
}
 0x1b1   : > { %s646_s12 = scalar_lea.hbm %s823_s7, 128  ;;  %s650_s15 = scalar_lea.hbm %s870_s5, 256 }
 0x1b2   : > { %p647_p4 = scmp.ne.s32.totalorder %s823_s7, %s646_s12  ;;  %p651_p9 = scmp.lt.s32.totalorder %s823_s7, %s870_s5 }
 0x1b3   : > { %p652_p10 = scmp.lt.s32.totalorder %s650_s15, %s646_s12 }
 0x1b4   : > { %p648_p7 = pnand %p647_p4, %p765_p5 }
 0x1b5   : > { %p653_p11 = por %p652_p10, %p651_p9 }
 0x1b6   : > { %p649_p8 = pneg %p648_p7 }
 0x1b8   : > { %p654_p12 = pnand %p653_p11, %p649_p8 }
 0x1ba   : > { %657 = shalt.err (!%p654_p12)
}
 0x1bb   : > { %583 = dma.vmem_to_hbm [thread:$0]  (%p765_p5), %s825_s26, 128, %s823_s7, %s443_s8   ;;  %v582_v31 = vpop.f32.mrf.mxu0 }
 0x1bc PF: > { %p589_p13 = scmp.ge.s32.totalorder %s692_s21, 2  ;;  %s468_s23 = sand.u32 1, %s680_s18  }
 0x1bd   : > { %s469_s25 = scalar_lea.sflag [#allocation3], %s468_s23 }
 0x1be   : > { %p586_p0 = pnand %p589_p13, %p769_p6 }
 0x1c0   : > { %p587_p1 = pneg %p586_p0 }
 0x1c2   : > { %675 = dma.done.wait (%p587_p1), %s469_s25, 128  }
 0x1c3   : > { %677 = vsyncadd (%p587_p1), %s469_s25, 4294967168  ;;  %p15_p2 = scmp.ge.s32.totalorder %s752_s24, 4   ;;  %s873_s18 = smov %s684_s19 }
 0x1c4   : > { %s874_s19 = smov %s688_s20  ;;  %s875_s20 = smov %s763_s27 }
 0x1c5   : > { %s876_s21 = smov %s752_s24  ;;  %17 = sbr.rel (!%p15_p2) target bundleno = 3 (0x3), region = 77 }
 0x1ca   :  { %474 = vsyncpa [#allocation3], 1 }
 0x1cb   :  { %476 = vsyncpa [#allocation3 + $0x1], 1 }

</bundles_post_ra>
